<compile_context>
chip_gen: v7x
topology: tpu7x:2x2x1
jax: 0.10.0
libtpu: 0.0.40
codegen_flags: <defaults>
</compile_context>

<pallas_src>
import jax
import jax.numpy as jnp
from jax.experimental import pallas as pl
from jax.experimental.pallas import tpu as pltpu


def _round_up(n, m):
    return ((n + m - 1) // m) * m


def _fir_kernel(x_ref, c_ref, o_ref, xw_ref, carry_ref):
    """One (batch_tile, time_tile) block of the causal FIR filter.

    x_ref     : (Bt, Tt)       current time tile of the zero-padded signal
    c_ref     : (Bt, L)        filter taps (same block for every time step -> resident)
    o_ref     : (Bt, Tt)       output tile
    xw_ref    : (Bt, Tt + W)   scratch: haloed window, W = round_up(L, 128)
    carry_ref : (Bt, L)        scratch: last L samples of the previous time tile
    """
    _, tt = x_ref.shape
    L = c_ref.shape[1]
    W = xw_ref.shape[1] - tt          # lane-aligned halo width (multiple of 128)
    t = pl.program_id(1)

    # First time tile of each batch tile: halo is zeros (causal filter).
    @pl.when(t == 0)
    def _():
        carry_ref[...] = jnp.zeros_like(carry_ref)

    # Assemble the haloed window so every tap is a plain static slice:
    #   xw[:, W + m]     = x_tile[:, m]
    #   xw[:, W - L + i] = carry[:, i]   (samples just before this tile)
    xw_ref[:, W - L:W] = carry_ref[...]
    xw_ref[:, W:] = x_ref[...]                      # lane-aligned bulk copy

    # Save the last L samples for the next (sequential) time tile.
    carry_ref[...] = x_ref[:, tt - L:]

    # Hoist the tap load out of the unrolled loop (small, stays in vregs).
    c = c_ref[...]                                  # (Bt, L)

    # Per-tap shifted slice + VPU FMA.  L (number of taps) is small and static,
    # so a Python unroll is fine; for very large L switch to
    # lax.fori_loop(..., unroll=True) over tap chunks.
    acc = jnp.zeros(o_ref.shape, jnp.float32)
    for k in range(L):
        acc = acc + c[:, k:k + 1] * xw_ref[:, W - k:W - k + tt]
    o_ref[...] = acc.astype(o_ref.dtype)


class Filter:
    """Pallas-TPU port of the Torch `Filter` module (FFT-based causal FIR)."""

    def __init__(self, sampling_rate, length, time_tile=None):
        self.sampling_rate = sampling_rate   # stored for parity; unused in forward
        self.length = length
        self.time_tile = time_tile           # optional tuning knob (multiple of 128)

    def __call__(self, x, coeff):
        B, T, _ = x.shape
        L = coeff.shape[1]
        assert L == self.length and 1 <= L <= T

        xs = x[..., 0].astype(jnp.float32)       # squeeze(-1): (B, T)
        cs = coeff[..., 0].astype(jnp.float32)   # taps:        (B, L)

        # ---- tile sizing ----------------------------------------------------
        # Lane-dense time tiles (multiple of 128); 512 is the measured sweet
        # spot and keeps double-buffered f32 tiles far below v7x's 64 MiB VMEM.
        if self.time_tile is not None:
            t_tile = self.time_tile
        elif T >= 512:
            t_tile = 512
        else:
            t_tile = _round_up(T, 128)
        t_tile = max(t_tile, _round_up(L, 128))  # carry/halo needs t_tile >= L
        assert t_tile % 128 == 0

        b_tile = B if B <= 8 else 8              # full-sublane batch tiles when possible

        B_p = _round_up(B, b_tile)
        T_p = _round_up(T, t_tile)
        if (B_p, T_p) != (B, T):
            xs = jnp.pad(xs, ((0, B_p - B), (0, T_p - T)))
            cs = jnp.pad(cs, ((0, B_p - B), (0, 0)))

        grid = (B_p // b_tile, T_p // t_tile)
        halo_w = _round_up(L, 128)

        out = pl.pallas_call(
            _fir_kernel,
            out_shape=jax.ShapeDtypeStruct((B_p, T_p), jnp.float32),
            grid=grid,
            in_specs=[
                # Signal: streamed time tiles, double-buffered by the pipeline.
                pl.BlockSpec((b_tile, t_tile), lambda b, t: (b, t)),
                # Taps: tiny block, constant over the time axis -> stays resident.
                pl.BlockSpec((b_tile, L), lambda b, t: (b, 0)),
            ],
            out_specs=pl.BlockSpec((b_tile, t_tile), lambda b, t: (b, t)),
            scratch_shapes=[
                pltpu.VMEM((b_tile, t_tile + halo_w), jnp.float32),  # haloed window
                pltpu.VMEM((b_tile, L), jnp.float32),                # carry between tiles
            ],
            compiler_params=pltpu.CompilerParams(
                # Batch tiles are independent (megacore-splittable on v7x);
                # the time axis carries the halo, so it must stay sequential.
                dimension_semantics=("parallel", "arbitrary"),
                vmem_limit_bytes=32 * 1024 * 1024,
            ),
        )(xs, cs)

        return out[:B, :T]


def _fft_reference(x, coeff, length):
    # Pure-JAX transcription of the Torch forward's intended FFT path.
    T = x.shape[1]
    c = jnp.pad(coeff, ((0, 0), (0, T - length), (0, 0)))[..., 0]    # (B, T)
    xs = x[..., 0]                                                   # (B, T)
    xs = jnp.pad(xs, ((0, 0), (0, xs.shape[-1])))                    # (B, 2T)
    c = jnp.pad(c, ((0, 0), (c.shape[-1], 0)))                       # (B, 2T)
    y = jnp.fft.irfft(jnp.fft.rfft(xs) * jnp.fft.rfft(c))
    return y[..., y.shape[-1] // 2:]


if __name__ == "__main__":
    key = jax.random.PRNGKey(0)

    # Case 1: toy size implied by the module (single time tile).
    kx, kc = jax.random.split(key)
    B, T, L = 2, 16, 8
    x = jax.random.normal(kx, (B, T, 1), dtype=jnp.float32)
    coeff = jax.random.normal(kc, (B, L, 1), dtype=jnp.float32)
    y = jax.block_until_ready(Filter(sampling_rate=16000, length=L)(x, coeff))
    assert y.shape == (B, T)
    assert jnp.allclose(y, _fft_reference(x, coeff, L), atol=1e-3, rtol=1e-3)

    # Case 2: multiple time tiles (exercises the halo carry across tiles).
    kx2, kc2 = jax.random.split(kc)
    B2, T2, L2 = 2, 256, 8
    x2 = jax.random.normal(kx2, (B2, T2, 1), dtype=jnp.float32)
    coeff2 = jax.random.normal(kc2, (B2, L2, 1), dtype=jnp.float32)
    y2 = jax.block_until_ready(
        Filter(sampling_rate=16000, length=L2, time_tile=128)(x2, coeff2))
    assert y2.shape == (B2, T2)
    assert jnp.allclose(y2, _fft_reference(x2, coeff2, L2), atol=1e-3, rtol=1e-3)

    print("KERNEL_OK")
</pallas_src>

<mosaic_0001>
module attributes {stable_mosaic.version = 11 : i64} {
  func.func @_fir_kernel(%arg0: i32, %arg1: i32, %arg2: memref<2x128xf32, #tpu.memory_space<vmem>>, %arg3: memref<2x8xf32, #tpu.memory_space<vmem>>, %arg4: memref<2x128xf32, #tpu.memory_space<vmem>>, %arg5: memref<2x256xf32, #tpu.memory_space<vmem>>, %arg6: memref<2x8xf32, #tpu.memory_space<vmem>>) attributes {dimension_semantics = [#tpu.dimension_semantics<parallel>, #tpu.dimension_semantics<arbitrary>], iteration_bounds = array<i64: 1, 1>, scalar_prefetch = 0 : i64, scratch_operands = 2 : i64, tpu.core_type = #tpu.core_type<tc>, window_params = [{transform_indices = @transform_0, window_bounds = array<i64: 2, 128>}, {transform_indices = @transform_1, window_bounds = array<i64: 2, 8>}, {transform_indices = @transform_2, window_bounds = array<i64: 2, 128>}]} {
    %c0_i32 = arith.constant 0 : i32
    %0 = arith.cmpi eq, %arg1, %c0_i32 : i32
    %1 = arith.extui %0 : i1 to i32
    %c0_i32_0 = arith.constant 0 : i32
    %2 = arith.cmpi ne, %1, %c0_i32_0 : i32
    scf.if %2 {
      %cst_23 = arith.constant 0.000000e+00 : f32
      %52 = vector.broadcast %cst_23 : f32 to vector<2x8xf32>
      %c0_24 = arith.constant 0 : index
      %c0_25 = arith.constant 0 : index
      %53 = vector.load %arg6[%c0_24, %c0_25] : memref<2x8xf32, #tpu.memory_space<vmem>>, vector<2x8xf32>
      tpu.vector_store %arg6[%c0_24, %c0_25], %52 {strides = array<i32>} : memref<2x8xf32, #tpu.memory_space<vmem>>, vector<2x8xf32>,
    } else {
    }
    %c0 = arith.constant 0 : index
    %c0_1 = arith.constant 0 : index
    %3 = vector.load %arg6[%c0, %c0_1] : memref<2x8xf32, #tpu.memory_space<vmem>>, vector<2x8xf32>
    %c0_2 = arith.constant 0 : index
    %c120 = arith.constant 120 : index
    %4 = vector.load %arg5[%c0_2, %c120] : memref<2x256xf32, #tpu.memory_space<vmem>>, vector<2x8xf32>
    tpu.vector_store %arg5[%c0_2, %c120], %3 {strides = array<i32>} : memref<2x256xf32, #tpu.memory_space<vmem>>, vector<2x8xf32>,
    %c0_3 = arith.constant 0 : index
    %c0_4 = arith.constant 0 : index
    %5 = vector.load %arg2[%c0_3, %c0_4] : memref<2x128xf32, #tpu.memory_space<vmem>>, vector<2x128xf32>
    %c0_5 = arith.constant 0 : index
    %c128 = arith.constant 128 : index
    %6 = vector.load %arg5[%c0_5, %c128] : memref<2x256xf32, #tpu.memory_space<vmem>>, vector<2x128xf32>
    tpu.vector_store %arg5[%c0_5, %c128], %5 {strides = array<i32>} : memref<2x256xf32, #tpu.memory_space<vmem>>, vector<2x128xf32>,
    %c0_6 = arith.constant 0 : index
    %c120_7 = arith.constant 120 : index
    %7 = vector.load %arg2[%c0_6, %c120_7] : memref<2x128xf32, #tpu.memory_space<vmem>>, vector<2x8xf32>
    %c0_8 = arith.constant 0 : index
    %c0_9 = arith.constant 0 : index
    %8 = vector.load %arg6[%c0_8, %c0_9] : memref<2x8xf32, #tpu.memory_space<vmem>>, vector<2x8xf32>
    tpu.vector_store %arg6[%c0_8, %c0_9], %7 {strides = array<i32>} : memref<2x8xf32, #tpu.memory_space<vmem>>, vector<2x8xf32>,
    %c0_10 = arith.constant 0 : index
    %c0_11 = arith.constant 0 : index
    %9 = vector.load %arg3[%c0_10, %c0_11] : memref<2x8xf32, #tpu.memory_space<vmem>>, vector<2x8xf32>
    %cst = arith.constant 0.000000e+00 : f32
    %10 = vector.broadcast %cst : f32 to vector<2x128xf32>
    %11 = vector.extract_strided_slice %9 {offsets = [0, 0], sizes = [2, 1], strides = [1, 1]} : vector<2x8xf32> to vector<2x1xf32>
    %c0_12 = arith.constant 0 : index
    %c128_13 = arith.constant 128 : index
    %12 = vector.load %arg5[%c0_12, %c128_13] : memref<2x256xf32, #tpu.memory_space<vmem>>, vector<2x128xf32>
    %13 = vector.broadcast %11 : vector<2x1xf32> to vector<2x128xf32>
    %14 = arith.mulf %13, %12 : vector<2x128xf32>
    %15 = arith.addf %10, %14 : vector<2x128xf32>
    %16 = vector.extract_strided_slice %9 {offsets = [0, 1], sizes = [2, 1], strides = [1, 1]} : vector<2x8xf32> to vector<2x1xf32>
    %c0_14 = arith.constant 0 : index
    %c127 = arith.constant 127 : index
    %17 = vector.load %arg5[%c0_14, %c127] : memref<2x256xf32, #tpu.memory_space<vmem>>, vector<2x128xf32>
    %18 = vector.broadcast %16 : vector<2x1xf32> to vector<2x128xf32>
    %19 = arith.mulf %18, %17 : vector<2x128xf32>
    %20 = arith.addf %15, %19 : vector<2x128xf32>
    %21 = vector.extract_strided_slice %9 {offsets = [0, 2], sizes = [2, 1], strides = [1, 1]} : vector<2x8xf32> to vector<2x1xf32>
    %c0_15 = arith.constant 0 : index
    %c126 = arith.constant 126 : index
    %22 = vector.load %arg5[%c0_15, %c126] : memref<2x256xf32, #tpu.memory_space<vmem>>, vector<2x128xf32>
    %23 = vector.broadcast %21 : vector<2x1xf32> to vector<2x128xf32>
    %24 = arith.mulf %23, %22 : vector<2x128xf32>
    %25 = arith.addf %20, %24 : vector<2x128xf32>
    %26 = vector.extract_strided_slice %9 {offsets = [0, 3], sizes = [2, 1], strides = [1, 1]} : vector<2x8xf32> to vector<2x1xf32>
    %c0_16 = arith.constant 0 : index
    %c125 = arith.constant 125 : index
    %27 = vector.load %arg5[%c0_16, %c125] : memref<2x256xf32, #tpu.memory_space<vmem>>, vector<2x128xf32>
    %28 = vector.broadcast %26 : vector<2x1xf32> to vector<2x128xf32>
    %29 = arith.mulf %28, %27 : vector<2x128xf32>
    %30 = arith.addf %25, %29 : vector<2x128xf32>
    %31 = vector.extract_strided_slice %9 {offsets = [0, 4], sizes = [2, 1], strides = [1, 1]} : vector<2x8xf32> to vector<2x1xf32>
    %c0_17 = arith.constant 0 : index
    %c124 = arith.constant 124 : index
    %32 = vector.load %arg5[%c0_17, %c124] : memref<2x256xf32, #tpu.memory_space<vmem>>, vector<2x128xf32>
    %33 = vector.broadcast %31 : vector<2x1xf32> to vector<2x128xf32>
    %34 = arith.mulf %33, %32 : vector<2x128xf32>
    %35 = arith.addf %30, %34 : vector<2x128xf32>
    %36 = vector.extract_strided_slice %9 {offsets = [0, 5], sizes = [2, 1], strides = [1, 1]} : vector<2x8xf32> to vector<2x1xf32>
    %c0_18 = arith.constant 0 : index
    %c123 = arith.constant 123 : index
    %37 = vector.load %arg5[%c0_18, %c123] : memref<2x256xf32, #tpu.memory_space<vmem>>, vector<2x128xf32>
    %38 = vector.broadcast %36 : vector<2x1xf32> to vector<2x128xf32>
    %39 = arith.mulf %38, %37 : vector<2x128xf32>
    %40 = arith.addf %35, %39 : vector<2x128xf32>
    %41 = vector.extract_strided_slice %9 {offsets = [0, 6], sizes = [2, 1], strides = [1, 1]} : vector<2x8xf32> to vector<2x1xf32>
    %c0_19 = arith.constant 0 : index
    %c122 = arith.constant 122 : index
    %42 = vector.load %arg5[%c0_19, %c122] : memref<2x256xf32, #tpu.memory_space<vmem>>, vector<2x128xf32>
    %43 = vector.broadcast %41 : vector<2x1xf32> to vector<2x128xf32>
    %44 = arith.mulf %43, %42 : vector<2x128xf32>
    %45 = arith.addf %40, %44 : vector<2x128xf32>
    %46 = vector.extract_strided_slice %9 {offsets = [0, 7], sizes = [2, 1], strides = [1, 1]} : vector<2x8xf32> to vector<2x1xf32>
    %c0_20 = arith.constant 0 : index
    %c121 = arith.constant 121 : index
    %47 = vector.load %arg5[%c0_20, %c121] : memref<2x256xf32, #tpu.memory_space<vmem>>, vector<2x128xf32>
    %48 = vector.broadcast %46 : vector<2x1xf32> to vector<2x128xf32>
    %49 = arith.mulf %48, %47 : vector<2x128xf32>
    %50 = arith.addf %45, %49 : vector<2x128xf32>
    %c0_21 = arith.constant 0 : index
    %c0_22 = arith.constant 0 : index
    %51 = vector.load %arg4[%c0_21, %c0_22] : memref<2x128xf32, #tpu.memory_space<vmem>>, vector<2x128xf32>
    tpu.vector_store %arg4[%c0_21, %c0_22], %50 {strides = array<i32>} : memref<2x128xf32, #tpu.memory_space<vmem>>, vector<2x128xf32>,
    return
  }
  func.func @transform_0(%arg0: i32, %arg1: i32) -> (i32, i32) {
    %c0_i32 = arith.constant 0 : i32
    return %arg0, %arg1 : i32, i32
  }
  func.func @transform_1(%arg0: i32, %arg1: i32) -> (i32, i32) {
    %c0_i32 = arith.constant 0 : i32
    %c0_i32_0 = arith.constant 0 : i32
    return %arg0, %c0_i32 : i32, i32
  }
  func.func @transform_2(%arg0: i32, %arg1: i32) -> (i32, i32) {
    %c0_i32 = arith.constant 0 : i32
    return %arg0, %arg1 : i32, i32
  }
}

</mosaic_0001>

<bundles_post_ra>
// kernel: tpu_custom_call.1
= control target key start
LH: loop header
LB: loop body
LE: loop exit
PB: predicated region body
PF: predicated region fallthrough
CT: control target
= control target key end

     0   :  { %7 = vsyncpa [#allocation5], 0  ;;  %s387_s0 = inlined_call_operand.hbm [shape: f32[2,128], index: 0, kind: input, shape index: {}]   ;;  %s388_s1 = inlined_call_operand.vmem [shape: f32[2,8], index: 1, kind: input, shape index: {}]   ;;  %s389_s2 = inlined_call_operand.hbm [shape: f32[2,128], index: 2, kind: output, shape index: {}]  }
   0x1   :  { %8 = vsyncpa [#allocation6], 0  ;;  %s323_s9 = smov [#allocation4]   ;;  %s275_s13 = scalar_lea.hbm %s387_s0, 32 }
   0x2   :  { %s15_s10 = sshll.u32 %s323_s9, 4  ;;  %p276_p0 = scmp.ne.s32.totalorder %s387_s0, %s275_s13  ;;  %s16_s10 = int_to_ptr.vmem [resolvable:$true] %s15_s10 }
   0x3   :  { %p279_p1 = scmp.lt.u32.totalorder %s275_s13, %s387_s0 }
   0x5   :  { %p281_p2 = pnand %p279_p1, %p276_p0 }
   0x7   :  { %284 = shalt.err (!%p281_p2)
}
   0x8   :  { %s285_s18 = scalar_lea.vmem %s16_s10, 32  ;;  %p290_p4 = scmp.lt.s32.totalorder %s16_s10, %s16_s10 }
   0x9   :  { %p286_p3 = scmp.ne.s32.totalorder %s16_s10, %s285_s18  ;;  %p291_p5 = scmp.lt.s32.totalorder %s285_s18, %s285_s18 }
   0xb   :  { %p292_p6 = por %p291_p5, %p290_p4 }
   0xd   :  { %p293_p7 = pnand %p292_p6, %p286_p3 }
   0xf   :  { %296 = shalt.err (!%p293_p7)
}
  0x10   :  { %18 = dma.hbm_to_vmem [thread:$0]  %s387_s0, 32, %s16_s10, [#allocation5]  }
  0x11   :  { %319 = dma.done.wait [#allocation5], 32  }
  0x12   :  { %320 = vsyncadd [#allocation5], 4294967264  ;;  %vm28_vm0 = vcmask 58368   ;;  %v324_v0 = vmov 0.0   ;;  %v325_v1 = vmov 0   ;;  %v326_v2 = vmov 1  }
  0x13   :  { %29 = vst.msk [vmem:[#allocation3] sm:$0x3] %vm28_vm0, %v324_v0  ;;  %267 = vset.pattern.permute.xlu0 %v325_v1  ;;  %268 = vset.pattern.permute.xlu1 %v326_v2  ;;  %v53_v3 = vld [vmem:[%s388_s1] sm:$0x3]  ;;  %v44_v4 = vld [vmem:[#allocation4] sm:$0x3] }
  0x14   :  { %64 = vperm.xlu1 %268, %v53_v3   ;;  %45 = vst [vmem:[#allocation2 + $0x2] sm:$0x3] %v44_v4  ;;  %s327_s23 = smov 120   ;;  %v328_v6 = vmov 2   ;;  %v329_v7 = vmov 4   ;;  %v330_v8 = vmov 3  }
  0x15   :  { %v331_v9 = vmov 5   ;;  %v332_v10 = vmov 6   ;;  %v333_v11 = vmov 7   ;;  %vm42_vm1 = vcmask 1042368   ;;  %s334_s0 = smov 2   ;;  %s335_s1 = smov 1  }
  0x16   :  { %s336_s24 = smov 3   ;;  %s337_s25 = smov 4   ;;  %v46_v14 = vld [vmem:[#allocation4] sm:$0x3]  ;;  %vm80_vm2 = vcmask 7168   ;;  %vm103_vm3 = vcmask 15360  }
  0x17   :  { %s338_s26 = smov 6   ;;  %s339_s27 = smov 5   ;;  %vm126_vm4 = vcmask 23552   ;;  %vm149_vm5 = vcmask 31744   ;;  %vm172_vm6 = vcmask 39936   ;;  %vm195_vm7 = vcmask 48128  }
  0x18   :  { %269 = vset.pattern.permute.xlu1 %v328_v6  ;;  %s340_s28 = smov 7   ;;  %s341_s29 = smov 8   ;;  %vm218_vm8 = vcmask 56320  }
  0x19   :  { %87 = vperm.xlu1 %269, %v53_v3   ;;  %s342_s30 = smov [#allocation7]  }
  0x1a   :  { %v239_v5 = vld.sshfl [vmem:[#allocation3] sm:$0x3 pattern:$0x76325410]  ;;  %s230_s3 = sshll.u32 %s342_s30, 4  ;;  %s231_s3 = int_to_ptr.vmem [resolvable:$true] %s230_s3 }
  0x1b   :  { %39 = vrot.lane.b32.xlu0 %v239_v5, %s327_s23  ;;  %v54_v35 = vld [vmem:[#allocation2 + $0x2] sm:$0x3]  ;;  %s297_s4 = scalar_lea.vmem %s231_s3, 32  ;;  %p302_p9 = scmp.lt.s32.totalorder %s231_s3, %s231_s3 }
  0x1c   :  { %p298_p8 = scmp.ne.s32.totalorder %s231_s3, %s297_s4  ;;  %p303_p10 = scmp.lt.s32.totalorder %s297_s4, %s297_s4 }
  0x1d   :  { %270 = vset.pattern.permute.xlu1 %v330_v8 }
  0x1e   :  { %110 = vperm.xlu1 %270, %v53_v3   ;;  %p304_p11 = por %p303_p10, %p302_p9 }
  0x1f   :  { %57 = vperm.xlu0 %267, %v53_v3  }
  0x20   :  { %p305_p12 = pnand %p304_p11, %p298_p8 }
  0x23   :  { %271 = vset.pattern.permute.xlu0 %v329_v7 }
  0x24   :  { %133 = vperm.xlu0 %271, %v53_v3  }
  0x28   :  { %272 = vset.pattern.permute.xlu0 %v331_v9 }
  0x29   :  { %156 = vperm.xlu0 %272, %v53_v3  }
  0x2d   :  { %273 = vset.pattern.permute.xlu0 %v332_v10 }
  0x2e   :  { %179 = vperm.xlu0 %273, %v53_v3  }
  0x32   :  { %274 = vset.pattern.permute.xlu0 %v333_v11 }
  0x8d   :  { %v40_v12 = vpop.permute.xlu0 %39 }
  0x8e   :  { %43 = vst.msk [vmem:[#allocation2] sm:$0x3] %vm42_vm1, %v40_v12 }
  0x93   :  { %v65_v16 = vpop.permute.xlu1 %64 }
  0x95   :  { %v241_v13 = vld.sshfl [vmem:[#allocation2] sm:$0x33 pattern:$0x76325410] }
  0x96   :  { %99 = vrot.lane.b32.xlu1 %v241_v13, %s334_s0  ;;  %76 = vrot.lane.b32.xlu0 %v241_v13, %s335_s1  ;;  %v98_v15 = vcombine.high %v241_v13, %v241_v13 }
  0x98   :  { %v88_v17 = vpop.permute.xlu1 %87 }
  0x9a   :  { %122 = vrot.lane.b32.xlu1 %v241_v13, %s336_s24  ;;  %202 = vperm.xlu0 %274, %v53_v3  }
  0x9d   :  { %v111_v19 = vpop.permute.xlu1 %110 }
  0x9e   :  { %145 = vrot.lane.b32.xlu1 %v241_v13, %s337_s25  ;;  %191 = vrot.lane.b32.xlu0 %v241_v13, %s338_s26  ;;  %v58_v18 = vpop.permute.xlu0 %57 }
  0x9f   :  { %v60_v41 = vmul.f32 %v58_v18, %v54_v35 }
  0xa2   :  { %168 = vrot.lane.b32.xlu1 %v241_v13, %s339_s27  ;;  %214 = vrot.lane.b32.xlu0 %v241_v13, %s340_s28 }
  0xa3   :  { %v134_v20 = vpop.permute.xlu0 %133 }
  0xa6   :  { %78 = vrot.lane.b32.xlu1 %v98_v15, %s335_s1  ;;  %48 = vrot.lane.b32.xlu0 %v46_v14, %s341_s29 }
  0xa8   :  { %v157_v22 = vpop.permute.xlu0 %156 }
  0xaa   :  { %101 = vrot.lane.b32.xlu1 %v98_v15, %s334_s0 }
  0xad   :  { %v180_v24 = vpop.permute.xlu0 %179 }
  0xae   :  { %124 = vrot.lane.b32.xlu1 %v98_v15, %s336_s24 }
  0xb2   :  { %147 = vrot.lane.b32.xlu1 %v98_v15, %s337_s25 }
  0xb6   :  { %170 = vrot.lane.b32.xlu1 %v98_v15, %s339_s27 }
  0xba   :  { %193 = vrot.lane.b32.xlu1 %v98_v15, %s338_s26 }
  0xbe   :  { %216 = vrot.lane.b32.xlu1 %v98_v15, %s340_s28 }
 0x108   :  { %v100_v21 = vpop.permute.xlu1 %99  ;;  %v77_v27 = vpop.permute.xlu0 %76 }
 0x10c   :  { %v123_v23 = vpop.permute.xlu1 %122 }
 0x110   :  { %v146_v25 = vpop.permute.xlu1 %145 }
 0x114   :  { %v169_v26 = vpop.permute.xlu1 %168 }
 0x118   :  { %v79_v28 = vpop.permute.xlu1 %78 }
 0x119   :  { %v203_v29 = vpop.permute.xlu0 %202  ;;  %v81_v33 = vsel %vm80_vm2, %v77_v27, %v79_v28 }
 0x11a   :  { %v83_v37 = vmul.f32 %v81_v33, %v65_v16 }
 0x11c   :  { %v102_v30 = vpop.permute.xlu1 %101  ;;  %v84_v44 = vadd.f32 %v83_v37, %v60_v41 }
 0x11d   :  { %v192_v31 = vpop.permute.xlu0 %191  ;;  %v104_v36 = vsel %vm103_vm3, %v100_v21, %v102_v30 }
 0x11e   :  { %v106_v42 = vmul.f32 %v104_v36, %v88_v17 }
 0x120   :  { %v125_v32 = vpop.permute.xlu1 %124  ;;  %v107_v48 = vadd.f32 %v106_v42, %v84_v44 }
 0x121   :  { %v215_v34 = vpop.permute.xlu0 %214  ;;  %v127_v39 = vsel %vm126_vm4, %v123_v23, %v125_v32 }
 0x122   :  { %v129_v45 = vmul.f32 %v127_v39, %v111_v19 }
 0x124   :  { %v148_v38 = vpop.permute.xlu1 %147  ;;  %v130_v50 = vadd.f32 %v129_v45, %v107_v48 }
 0x125   :  { %v49_v40 = vpop.permute.xlu0 %48  ;;  %v150_v43 = vsel %vm149_vm5, %v146_v25, %v148_v38 }
 0x126   :  { %52 = vst.msk [vmem:[#allocation3] sm:$0x3] %vm28_vm0, %v49_v40  ;;  %v152_v49 = vmul.f32 %v150_v43, %v134_v20 }
 0x128   :  { %v171_v46 = vpop.permute.xlu1 %170  ;;  %v153_v54 = vadd.f32 %v152_v49, %v130_v50 }
 0x129   :  { %v173_v47 = vsel %vm172_vm6, %v169_v26, %v171_v46 }
 0x12a   :  { %v175_v51 = vmul.f32 %v173_v47, %v157_v22 }
 0x12c   :  { %v194_v52 = vpop.permute.xlu1 %193  ;;  %v176_v56 = vadd.f32 %v175_v51, %v153_v54 }
 0x12d   :  { %v196_v53 = vsel %vm195_vm7, %v192_v31, %v194_v52 }
 0x12e   :  { %v198_v55 = vmul.f32 %v196_v53, %v180_v24 }
 0x130   :  { %v217_v57 = vpop.permute.xlu1 %216  ;;  %v199_v59 = vadd.f32 %v198_v55, %v176_v56 }
 0x131   :  { %v219_v58 = vsel %vm218_vm8, %v215_v34, %v217_v57 }
 0x132   :  { %v221_v60 = vmul.f32 %v219_v58, %v203_v29 }
 0x134   :  { %v222_v61 = vadd.f32 %v221_v60, %v199_v59 }
 0x136   :  { %223 = vst [vmem:[#allocation7] sm:$0x3] %v222_v61 }
 0x137   :  { %308 = shalt.err (!%p305_p12)
}
 0x138   :  { %s309_s7 = scalar_lea.hbm %s389_s2, 32 }
 0x139   :  { %p310_p13 = scmp.ne.s32.totalorder %s389_s2, %s309_s7  ;;  %p313_p0 = scmp.lt.u32.totalorder %s309_s7, %s389_s2 }
 0x13b   :  { %p315_p1 = pnand %p313_p0, %p310_p13 }
 0x13d   :  { %318 = shalt.err (!%p315_p1)
}
 0x13e   :  { %233 = dma.vmem_to_hbm [thread:$0]  %s231_s3, 32, %s389_s2, [#allocation6]  }
 0x13f   :  { %321 = dma.done.wait [#allocation6], 32  }
 0x140   :  { %322 = vsyncadd [#allocation6], 4294967264 }
 0x141   :  { %237 = vsyncpa [#allocation5], 1 }
 0x142   :  { %238 = vsyncpa [#allocation6], 1 }

</bundles_post_ra>
